<compile_context>
chip_gen: v7x
topology: tpu7x:2x2x1
jax: 0.10.0
libtpu: 0.0.40
codegen_flags: <defaults>
</compile_context>

<pallas_src>
import functools

import numpy as np
import jax
import jax.numpy as jnp
from jax.experimental import pallas as pl
from jax.experimental.pallas import tpu as pltpu


_LANE = 128
_SUBLANE = 8
_VMEM_BUDGET = 20 * 1024 * 1024   # working-set budget used for tile selection
_VMEM_LIMIT = 48 * 1024 * 1024    # scoped VMEM limit (< v7x's 64 MiB physical)


def _round_up(x, m):
    return ((x + m - 1) // m) * m


# ----------------------------------------------------------------------------
# Pallas kernels: tiled matmul (+bias, optional fused ReLU) and batched matmul
# ----------------------------------------------------------------------------

def _mm_kernel(a_ref, b_ref, bias_ref, o_ref, *, relu):
    acc = jnp.dot(a_ref[...], b_ref[...], preferred_element_type=jnp.float32)
    acc = acc + bias_ref[...]
    if relu:
        acc = jnp.maximum(acc, 0.0)
    o_ref[...] = acc


def pallas_matmul(a, b, bias=None, relu=False, tile_m=512):
    """(M, K) @ (K, N) + bias with optional fused ReLU.

    bf16 MXU operands / fp32 accumulate.  N is padded up to a multiple of 128
    so output stores are lane-dense; M is tiled as large as the VMEM budget
    allows while keeping >=2 grid steps (so both v7x TensorCores get work).
    Padded M rows receive bias/ReLU too, but are sliced off before returning.
    """
    M, K = a.shape
    K2, N = b.shape
    assert K == K2
    a = a.astype(jnp.bfloat16)
    b = b.astype(jnp.bfloat16)
    if bias is None:
        bias = jnp.zeros((N,), jnp.float32)
    bias = bias.astype(jnp.float32)

    Np = _round_up(N, _LANE)
    if Np != N:
        b = jnp.pad(b, ((0, 0), (0, Np - N)))
        bias = jnp.pad(bias, ((0, Np - N),))
    bias = bias.reshape(1, Np)

    # VMEM-aware tile: 2x double-buffered A (bf16) + O (fp32) tiles, resident B.
    bytes_fixed = K * Np * 2 + Np * 4
    per_row = 2 * (K * 2 + Np * 4)
    budget_rows = max(_SUBLANE, (_VMEM_BUDGET - bytes_fixed) // max(per_row, 1))
    tm = min(tile_m, budget_rows, _round_up(M, _SUBLANE))
    tm = max(_SUBLANE, (tm // _SUBLANE) * _SUBLANE)
    if M > 2 * _SUBLANE:   # keep >=2 grid steps where possible (v7x: 2 TCs)
        tm = min(tm, _round_up((M + 1) // 2, _SUBLANE))
    Mp = _round_up(M, tm)
    a_p = jnp.pad(a, ((0, Mp - M), (0, 0)))

    out = pl.pallas_call(
        functools.partial(_mm_kernel, relu=relu),
        out_shape=jax.ShapeDtypeStruct((Mp, Np), jnp.float32),
        grid=(Mp // tm,),
        in_specs=[
            pl.BlockSpec((tm, K), lambda i: (i, 0)),
            pl.BlockSpec((K, Np), lambda i: (0, 0)),
            pl.BlockSpec((1, Np), lambda i: (0, 0)),
        ],
        out_specs=pl.BlockSpec((tm, Np), lambda i: (i, 0)),
        compiler_params=pltpu.CompilerParams(
            dimension_semantics=("parallel",),
            vmem_limit_bytes=_VMEM_LIMIT),
    )(a_p, b, bias)
    return out[:M, :N]


def _bmm_kernel(a_ref, b_ref, o_ref, *, bb):
    for j in range(bb):   # static unroll over the batch block
        o_ref[j] = jnp.dot(a_ref[j], b_ref[j], preferred_element_type=jnp.float32)


def pallas_bmm(a, b):
    """Batched matmul (B, M, K) @ (B, K, N) -> (B, M, N), fp32 out.

    bf16 MXU operands / fp32 accumulate; M padded to a sublane multiple, N to
    a lane multiple (lane-dense stores); several batch entries per grid step
    while keeping >=2 grid steps for the two v7x TensorCores.
    """
    B, M, K = a.shape
    _, _, N = b.shape
    a = a.astype(jnp.bfloat16)
    b = b.astype(jnp.bfloat16)
    Mp = _round_up(M, _SUBLANE)
    Np = _round_up(N, _LANE)
    if Mp != M:
        a = jnp.pad(a, ((0, 0), (0, Mp - M), (0, 0)))
    if Np != N:
        b = jnp.pad(b, ((0, 0), (0, 0), (0, Np - N)))
    bb = max(1, B // 2)                    # >=2 grid steps whenever B >= 2
    Bp = _round_up(B, bb)
    if Bp != B:
        a = jnp.pad(a, ((0, Bp - B), (0, 0), (0, 0)))
        b = jnp.pad(b, ((0, Bp - B), (0, 0), (0, 0)))

    out = pl.pallas_call(
        functools.partial(_bmm_kernel, bb=bb),
        out_shape=jax.ShapeDtypeStruct((Bp, Mp, Np), jnp.float32),
        grid=(Bp // bb,),
        in_specs=[
            pl.BlockSpec((bb, Mp, K), lambda i: (i, 0, 0)),
            pl.BlockSpec((bb, K, Np), lambda i: (i, 0, 0)),
        ],
        out_specs=pl.BlockSpec((bb, Mp, Np), lambda i: (i, 0, 0)),
        compiler_params=pltpu.CompilerParams(
            dimension_semantics=("parallel",),
            vmem_limit_bytes=_VMEM_LIMIT),
    )(a, b)
    return out[:B, :M, :N]


# ----------------------------------------------------------------------------
# Conv2d (NHWC bf16 im2col + Pallas matmul), normalization, interpolation
# ----------------------------------------------------------------------------

def conv2d(x, w, b, stride=(1, 1), padding=(0, 0), relu=False):
    """x: (N, Cin, H, W), w: (Cout, Cin, KH, KW), b: (Cout,). NCHW in/out."""
    N, Cin, H, W = x.shape
    Cout, _, KH, KW = w.shape
    sh, sw = stride
    ph, pw = padding
    OH = (H + 2 * ph - KH) // sh + 1
    OW = (W + 2 * pw - KW) // sw + 1

    # NHWC + bf16 before patch extraction: halves the HBM bytes of the
    # materialized im2col tensor and avoids a 6-D transpose of the blown-up
    # patches (the gather lands directly in (kh, kw, cin) column order).
    xp = jnp.pad(x.transpose(0, 2, 3, 1).astype(jnp.bfloat16),
                 ((0, 0), (ph, ph), (pw, pw), (0, 0)))
    ih = (jnp.arange(OH) * sh)[:, None, None, None] + jnp.arange(KH)[None, None, :, None]
    iw = (jnp.arange(OW) * sw)[None, :, None, None] + jnp.arange(KW)[None, None, None, :]
    ih = jnp.broadcast_to(ih, (OH, OW, KH, KW))
    iw = jnp.broadcast_to(iw, (OH, OW, KH, KW))
    patches = xp[:, ih, iw, :]                                # (N, OH, OW, KH, KW, Cin)
    patches = patches.reshape(N * OH * OW, KH * KW * Cin)
    wmat = w.transpose(2, 3, 1, 0).reshape(KH * KW * Cin, Cout)
    # TODO(synk): replace XLA-side im2col with in-kernel shifted-window
    # accumulation (strided pl.ds reads) to remove the KH*KW HBM duplication.
    out = pallas_matmul(patches, wmat, b, relu=relu)          # Pallas hot path
    return out.reshape(N, OH, OW, Cout).transpose(0, 3, 1, 2)


def group_norm(x, weight, bias, groups, eps=1e-5):
    # TODO(synk): fuse GN scale/shift + ReLU into a lightweight Pallas epilogue
    # pass to cut one HBM round-trip per building-block layer.
    shp = x.shape
    N, C = shp[0], shp[1]
    xr = x.reshape(N, groups, -1)
    mean = xr.mean(axis=2, keepdims=True)
    var = ((xr - mean) ** 2).mean(axis=2, keepdims=True)
    xn = ((xr - mean) * jax.lax.rsqrt(var + eps)).reshape(shp)
    wshape = (1, C) + (1,) * (len(shp) - 2)
    return xn * weight.reshape(wshape) + bias.reshape(wshape)


def interpolate_bilinear_ac(x, out_hw):
    """F.interpolate(mode='bilinear', align_corners=True) for NCHW.

    Separable implementation: one row-gather pass + one column-gather pass
    (4 single gathers total) instead of nested double-gathers per corner.
    """
    N, C, H, W = x.shape
    OH, OW = out_hw

    def coords(in_sz, out_sz):
        if out_sz == 1:
            return jnp.zeros((out_sz,), jnp.float32)
        return jnp.arange(out_sz, dtype=jnp.float32) * ((in_sz - 1) / (out_sz - 1))

    ys = coords(H, OH)
    y0 = jnp.clip(jnp.floor(ys).astype(jnp.int32), 0, H - 1)
    y1 = jnp.clip(y0 + 1, 0, H - 1)
    wy = (ys - y0.astype(jnp.float32)).reshape(1, 1, OH, 1)
    rows = jnp.take(x, y0, axis=2) * (1.0 - wy) + jnp.take(x, y1, axis=2) * wy

    xs = coords(W, OW)
    x0 = jnp.clip(jnp.floor(xs).astype(jnp.int32), 0, W - 1)
    x1 = jnp.clip(x0 + 1, 0, W - 1)
    wx = (xs - x0.astype(jnp.float32)).reshape(1, 1, 1, OW)
    return jnp.take(rows, x0, axis=3) * (1.0 - wx) + jnp.take(rows, x1, axis=3) * wx


def interpolate_nearest(x, out_hw):
    """F.interpolate(mode='nearest') for NCHW — single fused gather."""
    N, C, H, W = x.shape
    OH, OW = out_hw
    iy = jnp.minimum(jnp.floor(jnp.arange(OH) * (H / OH)).astype(jnp.int32), H - 1)
    ix = jnp.minimum(jnp.floor(jnp.arange(OW) * (W / OW)).astype(jnp.int32), W - 1)
    flat = (iy[:, None] * W + ix[None, :]).reshape(-1)
    return jnp.take(x.reshape(N, C, H * W), flat, axis=2).reshape(N, C, OH, OW)


# ----------------------------------------------------------------------------
# CenterPivotConv4d
# ----------------------------------------------------------------------------

def center_pivot_conv4d(x, p, stride, padding):
    """x: (b, inch, ha, wa, hb, wb)."""
    s3, s4 = stride[2], stride[3]
    out1_in = x[:, :, :, :, ::s3, ::s4] if s4 > 1 else x   # == prune()

    b, inch, ha, wa, hb, wb = out1_in.shape
    o1 = out1_in.transpose(0, 4, 5, 1, 2, 3).reshape(b * hb * wb, inch, ha, wa)
    o1 = conv2d(o1, p['conv1']['w'], p['conv1']['b'], stride[:2], padding[:2])
    outch, oha, owa = o1.shape[1:]
    o1 = o1.reshape(b, hb, wb, outch, oha, owa).transpose(0, 3, 4, 5, 1, 2)

    b, inch, ha, wa, hb, wb = x.shape
    o2 = x.transpose(0, 2, 3, 1, 4, 5).reshape(b * ha * wa, inch, hb, wb)
    o2 = conv2d(o2, p['conv2']['w'], p['conv2']['b'], stride[2:], padding[2:])
    outch, ohb, owb = o2.shape[1:]
    o2 = o2.reshape(b, ha, wa, outch, ohb, owb).transpose(0, 3, 1, 2, 4, 5)

    # TODO(synk): the out1/out2 shape-mismatch branch only triggers for padding==0,
    # which never happens here (padding = ksz // 2 for all building blocks).
    return o1 + o2


def apply_building_block(x, layers):
    for layer in layers:
        ksz, stride, group = layer['ksz'], layer['stride'], layer['group']
        str4d = (1, 1, stride, stride)
        pad4d = (ksz // 2,) * 4
        x = center_pivot_conv4d(x, layer['cpconv'], str4d, pad4d)
        x = group_norm(x, layer['gn_w'], layer['gn_b'], group)
        x = jnp.maximum(x, 0.0)
    return x


# ----------------------------------------------------------------------------
# MGFEModule
# ----------------------------------------------------------------------------

def mgfe_enabled_feature(feats, masks):
    """feats: list of (b, c, h, w); masks: (b, m, H, W) binary.

    The two masked-average-pooling matmuls have only m (=2) rows / contraction,
    so they are pure launch overhead on the MXU — they stay in XLA as einsums
    (per performance review) instead of going through pallas_bmm.
    """
    b, m, H, W = masks.shape
    index_mask = jnp.full((b, H, W), m, jnp.int32)
    for i in range(m):
        index_mask = jnp.where(masks[:, i] == 1, i, index_mask)
    masks_oh = jax.nn.one_hot(index_mask, m + 1, dtype=jnp.float32)[..., :m]
    masks_oh = masks_oh.transpose(0, 3, 1, 2)                       # (b, m, H, W)

    enabled = []
    for feat in feats:
        fh, fw = feat.shape[-2:]
        tmask = interpolate_nearest(masks_oh, (fh, fw))             # (b, m, fh, fw)
        c = feat.shape[1]
        mask_flat = tmask.reshape(b, m, fh * fw)                    # (b, m, S)
        feat_flat = feat.reshape(b, c, fh * fw)                     # (b, c, S)
        feature_sum = jnp.einsum('bms,bcs->bmc', mask_flat, feat_flat)
        masked_sum = mask_flat.sum(axis=2, keepdims=True)
        map_features = feature_sum / (masked_sum + 1e-8)            # (b, m, c)
        fsum = jnp.einsum('bmc,bms->bcs', map_features, mask_flat)  # (b, c, S)
        fsum = fsum.reshape(b, c, fh, fw)
        sum_mask = tmask.sum(axis=1, keepdims=True)
        enabled.append(fsum / (sum_mask + 1e-8))
    return enabled


# ----------------------------------------------------------------------------
# SegmentationHead pieces
# ----------------------------------------------------------------------------

def fused_fg_bg_correlation(query_feats, support_feats, support_label):
    """One Pallas bmm per pyramid level: fg and bg support features are
    concatenated along the support-spatial axis so the correlation's N doubles
    (128-lane dense at the finest level) and the launch count halves."""
    corrs = []
    for q, s in zip(query_feats, support_feats):
        bsz, ch, hb, wb = s.shape
        lab = interpolate_bilinear_ac(support_label[:, None].astype(jnp.float32),
                                      (hb, wb))
        s_fg = (s * lab).reshape(bsz, ch, hb * wb)
        s_bg = (s * (1.0 - lab)).reshape(bsz, ch, hb * wb)
        s_fg = s_fg / (jnp.linalg.norm(s_fg, axis=1, keepdims=True) + 1e-5)
        s_bg = s_bg / (jnp.linalg.norm(s_bg, axis=1, keepdims=True) + 1e-5)
        s_cat = jnp.concatenate([s_fg, s_bg], axis=-1)              # (b, ch, 2*S_s)

        _, _, ha, wa = q.shape
        q_flat = q.reshape(bsz, ch, ha * wa)
        q_flat = q_flat / (jnp.linalg.norm(q_flat, axis=1, keepdims=True) + 1e-5)

        corr = pallas_bmm(q_flat.transpose(0, 2, 1), s_cat)         # (b, S_q, 2*S_s)
        corr = jnp.maximum(corr, 0.0)
        corr = corr.reshape(bsz, ha, wa, 2, hb, wb).transpose(0, 3, 1, 2, 4, 5)
        corrs.append(corr)                                          # (b, 2, ha, wa, hb, wb)
    return corrs


def interpolate_support_dims(hc, spatial_size):
    bsz, ch, ha, wa, hb, wb = hc.shape
    x = hc.transpose(0, 4, 5, 1, 2, 3).reshape(bsz * hb * wb, ch, ha, wa)
    x = interpolate_bilinear_ac(x, spatial_size)
    oha, owa = spatial_size
    return x.reshape(bsz, hb, wb, ch, oha, owa).transpose(0, 3, 4, 5, 1, 2)


def mgcd_forward(params, hypercorr_pyramid, query_mask=None):
    sqz4 = apply_building_block(hypercorr_pyramid[0], params['encoder_layer4'])
    sqz3 = apply_building_block(hypercorr_pyramid[1], params['encoder_layer3'])
    sqz2 = apply_building_block(hypercorr_pyramid[2], params['encoder_layer2'])

    sqz4 = interpolate_support_dims(sqz4, sqz3.shape[-4:-2])
    mix43 = sqz4 + sqz3
    mix43 = apply_building_block(mix43, params['encoder_layer4to3'])
    mix43 = interpolate_support_dims(mix43, sqz2.shape[-4:-2])
    mix432 = mix43 + sqz2
    mix432 = apply_building_block(mix432, params['encoder_layer3to2'])

    bsz, ch, ha, wa, hb, wb = mix432.shape
    encoded = mix432.reshape(bsz, ch, ha, wa, -1).mean(axis=-1)
    if query_mask is not None:
        enc2 = mgfe_enabled_feature([encoded], query_mask)[0]
        encoded = jnp.concatenate([encoded, enc2], axis=1)
    else:
        encoded = jnp.concatenate([encoded, encoded], axis=1)

    d1 = params['decoder1']
    x = conv2d(encoded, d1[0]['w'], d1[0]['b'], (1, 1), (1, 1), relu=True)
    x = conv2d(x, d1[1]['w'], d1[1]['b'], (1, 1), (1, 1), relu=True)
    # NOTE: matches the PyTorch reference, which uses (size(-1) * 2,) * 2.
    up = (x.shape[-1] * 2, x.shape[-1] * 2)
    x = interpolate_bilinear_ac(x, up)
    d2 = params['decoder2']
    x = conv2d(x, d2[0]['w'], d2[0]['b'], (1, 1), (1, 1), relu=True)
    logit = conv2d(x, d2[1]['w'], d2[1]['b'], (1, 1), (1, 1), relu=False)
    return logit


def segmentation_head_forward(params, query_feats, support_feats, support_label,
                              query_mask, support_masks):
    q_en = mgfe_enabled_feature(query_feats, query_mask)
    s_en = mgfe_enabled_feature(support_feats, support_masks)
    query_feats = [jnp.concatenate([a, b], axis=1) for a, b in zip(query_feats, q_en)]
    support_feats = [jnp.concatenate([a, b], axis=1) for a, b in zip(support_feats, s_en)]
    corr = fused_fg_bg_correlation(query_feats, support_feats, support_label)
    return mgcd_forward(params['mgcd'], corr[::-1], query_mask)


# ----------------------------------------------------------------------------
# Backbone stub (the pretrained ResNet/VGG backbone is untranslatable)
# ----------------------------------------------------------------------------

def extract_feats_stub(img, bparams):
    x = conv2d(img, bparams[0]['w'], bparams[0]['b'], (8, 8), (0, 0), relu=True)  # /8
    f2 = x
    x = conv2d(x, bparams[1]['w'], bparams[1]['b'], (2, 2), (1, 1), relu=True)    # /16
    f3 = x
    x = conv2d(x, bparams[2]['w'], bparams[2]['b'], (2, 2), (1, 1), relu=True)    # /32
    f4 = x
    return [f2, f3, f4]


def mgcl_forward(params, query_img, support_img, support_label, query_mask, support_masks):
    query_feats = extract_feats_stub(query_img, params['backbone'])
    support_feats = extract_feats_stub(support_img, params['backbone'])
    logit = segmentation_head_forward(params['seg_head'], query_feats, support_feats,
                                      support_label, query_mask, support_masks)
    logit = interpolate_bilinear_ac(logit, support_img.shape[2:])
    return logit


# ----------------------------------------------------------------------------
# Deterministic parameter initialization
# ----------------------------------------------------------------------------

def init_conv(key, cout, cin, kh, kw):
    kw_, kb_ = jax.random.split(key)
    fan_in = cin * kh * kw
    w = jax.random.normal(kw_, (cout, cin, kh, kw), jnp.float32) / np.sqrt(fan_in)
    b = jax.random.normal(kb_, (cout,), jnp.float32) * 0.01
    return {'w': w, 'b': b}


def init_building_block(key, in_channel, out_channels, kernel_sizes, spt_strides, group=4):
    layers = []
    keys = jax.random.split(key, len(out_channels))
    for idx, (outch, ksz, stride) in enumerate(zip(out_channels, kernel_sizes, spt_strides)):
        inch = in_channel if idx == 0 else out_channels[idx - 1]
        k1, k2 = jax.random.split(keys[idx])
        layers.append({
            'cpconv': {'conv1': init_conv(k1, outch, inch, ksz, ksz),
                       'conv2': init_conv(k2, outch, inch, ksz, ksz)},
            'gn_w': jnp.ones((outch,), jnp.float32),
            'gn_b': jnp.zeros((outch,), jnp.float32),
            'ksz': ksz, 'stride': stride, 'group': group,
        })
    return layers


if __name__ == "__main__":
    key = jax.random.PRNGKey(0)
    keys = jax.random.split(key, 20)

    B, H, W, M = 2, 64, 64, 2          # batch, image spatial, mask regions
    C2, C3, C4 = 8, 16, 32             # backbone-stub channels

    backbone = [init_conv(keys[0], C2, 3, 8, 8),
                init_conv(keys[1], C3, C2, 3, 3),
                init_conv(keys[2], C4, C3, 3, 3)]

    outch1, outch2, outch3, outch4 = 16, 32, 64, 128
    mgcd = {
        'encoder_layer4': init_building_block(keys[3], 2, [outch1, outch2, outch3], [3, 3, 3], [2, 2, 2]),
        'encoder_layer3': init_building_block(keys[4], 2, [outch1, outch2, outch3], [5, 3, 3], [4, 2, 2]),
        'encoder_layer2': init_building_block(keys[5], 2, [outch1, outch2, outch3], [5, 5, 3], [4, 4, 2]),
        'encoder_layer4to3': init_building_block(keys[6], outch3, [outch3] * 3, [3, 3, 3], [1, 1, 1]),
        'encoder_layer3to2': init_building_block(keys[7], outch3, [outch3] * 3, [3, 3, 3], [1, 1, 1]),
        'decoder1': [init_conv(keys[8], outch3, outch4, 3, 3),
                     init_conv(keys[9], outch2, outch3, 3, 3)],
        'decoder2': [init_conv(keys[10], outch1, outch2, 3, 3),
                     init_conv(keys[11], 2, outch1, 3, 3)],
    }
    params = {'backbone': backbone, 'seg_head': {'mgcd': mgcd}}

    query_img = jax.random.normal(keys[12], (B, 3, H, W), jnp.float32)
    support_img = jax.random.normal(keys[13], (B, 3, H, W), jnp.float32)
    support_label = (jax.random.uniform(keys[14], (B, H, W)) > 0.5).astype(jnp.float32)

    # binary multi-region masks; some pixels left unassigned (index == M)
    qm = jax.random.randint(keys[15], (B, H, W), 0, M + 1)
    query_mask = jnp.stack([(qm == i).astype(jnp.float32) for i in range(M)], axis=1)
    sm = jax.random.randint(keys[16], (B, H, W), 0, M + 1)
    support_masks = jnp.stack([(sm == i).astype(jnp.float32) for i in range(M)], axis=1)

    logit = mgcl_forward(params, query_img, support_img, support_label,
                         query_mask, support_masks)
    logit = jax.block_until_ready(logit)
    assert logit.shape == (B, 2, H, W), logit.shape
    assert bool(jnp.all(jnp.isfinite(logit)))
    print("KERNEL_OK")
</pallas_src>

<mosaic_0001>
module attributes {stable_mosaic.version = 11 : i64} {
  func.func @_mm_kernel(%arg0: i32, %arg1: memref<64x192xbf16, #tpu.memory_space<vmem>>, %arg2: memref<192x128xbf16, #tpu.memory_space<vmem>>, %arg3: memref<1x128xf32, #tpu.memory_space<vmem>>, %arg4: memref<64x128xf32, #tpu.memory_space<vmem>>) attributes {dimension_semantics = [#tpu.dimension_semantics<parallel>], iteration_bounds = array<i64: 2>, scalar_prefetch = 0 : i64, scratch_operands = 0 : i64, tpu.core_type = #tpu.core_type<tc>, window_params = [{transform_indices = @transform_0, window_bounds = array<i64: 64, 192>}, {pipeline_mode = #tpu.pipeline_mode<synchronous>, transform_indices = @transform_1, window_bounds = array<i64: 192, 128>}, {pipeline_mode = #tpu.pipeline_mode<synchronous>, transform_indices = @transform_2, window_bounds = array<i64: 1, 128>}, {transform_indices = @transform_3, window_bounds = array<i64: 64, 128>}]} {
    %c0 = arith.constant 0 : index
    %c0_0 = arith.constant 0 : index
    %0 = vector.load %arg1[%c0, %c0_0] : memref<64x192xbf16, #tpu.memory_space<vmem>>, vector<64x192xbf16>
    %c0_1 = arith.constant 0 : index
    %c0_2 = arith.constant 0 : index
    %1 = vector.load %arg2[%c0_1, %c0_2] : memref<192x128xbf16, #tpu.memory_space<vmem>>, vector<192x128xbf16>
    %cst = arith.constant dense<0.000000e+00> : vector<64x128xf32>
    %2 = tpu.matmul %0, %1, %cst {dimension_numbers = #tpu.dot_dimension_numbers<[1], [0], [0], [1], [0, 0, 1, 1], [], []>} : vector<64x192xbf16>, vector<192x128xbf16>, vector<64x128xf32> -> vector<64x128xf32>
    %c0_3 = arith.constant 0 : index
    %c0_4 = arith.constant 0 : index
    %3 = vector.load %arg3[%c0_3, %c0_4] : memref<1x128xf32, #tpu.memory_space<vmem>>, vector<1x128xf32>
    %4 = vector.broadcast %3 : vector<1x128xf32> to vector<64x128xf32>
    %5 = arith.addf %2, %4 : vector<64x128xf32>
    %cst_5 = arith.constant 0.000000e+00 : f32
    %6 = vector.broadcast %cst_5 : f32 to vector<64x128xf32>
    %7 = arith.maximumf %5, %6 : vector<64x128xf32>
    %c0_6 = arith.constant 0 : index
    %c0_7 = arith.constant 0 : index
    %8 = vector.load %arg4[%c0_6, %c0_7] : memref<64x128xf32, #tpu.memory_space<vmem>>, vector<64x128xf32>
    tpu.vector_store %arg4[%c0_6, %c0_7], %7 {strides = array<i32>} : memref<64x128xf32, #tpu.memory_space<vmem>>, vector<64x128xf32>,
    return
  }
  func.func @transform_0(%arg0: i32) -> (i32, i32) {
    %c0_i32 = arith.constant 0 : i32
    %c0_i32_0 = arith.constant 0 : i32
    return %arg0, %c0_i32 : i32, i32
  }
  func.func @transform_1(%arg0: i32) -> (i32, i32) {
    %c0_i32 = arith.constant 0 : i32
    %c0_i32_0 = arith.constant 0 : i32
    %c0_i32_1 = arith.constant 0 : i32
    return %c0_i32, %c0_i32_0 : i32, i32
  }
  func.func @transform_2(%arg0: i32) -> (i32, i32) {
    %c0_i32 = arith.constant 0 : i32
    %c0_i32_0 = arith.constant 0 : i32
    %c0_i32_1 = arith.constant 0 : i32
    return %c0_i32, %c0_i32_0 : i32, i32
  }
  func.func @transform_3(%arg0: i32) -> (i32, i32) {
    %c0_i32 = arith.constant 0 : i32
    %c0_i32_0 = arith.constant 0 : i32
    return %arg0, %c0_i32 : i32, i32
  }
}

</mosaic_0001>

<bundles_post_ra>
// kernel: tpu_custom_call.1
= control target key start
LH: loop header
LB: loop body
LE: loop exit
PB: predicated region body
PF: predicated region fallthrough
CT: control target
= control target key end

     0   :  { %8 = vsyncpa [#allocation3], 0  ;;  %s894_s0 = inlined_call_operand.vmem [shape: bf16[128,192], index: 0, kind: input, shape index: {}]   ;;  %s895_s1 = inlined_call_operand.vmem [shape: bf16[192,128], index: 1, kind: input, shape index: {}]   ;;  %s896_s2 = inlined_call_operand.vmem [shape: f32[1,128], index: 2, kind: input, shape index: {}]   ;;  %s897_s3 = inlined_call_operand.hbm [shape: f32[128,128], index: 3, kind: output, shape index: {}]  }
   0x1   :  { %10 = vsyncpa [#allocation3 + $0x1], 0  ;;  %s711_s12 = smov 0   ;;  %s713_s13 = smov 0  }
   0x2   :  { %s715_s14 = smov 0   ;;  %s717_s15 = smov 0  }
   0x3 LB: > { %s732_s16 = sadd.s32 4294967295, %s685_s15   ;;  %s493_s17 = sadd.s32 4294967294, %s685_s15   ;;  %s685_s15 = sphi %s717_s15, %s903_s15   ;;  %s681_s14 = sphi %s715_s14, %s902_s14   ;;  %s677_s13 = sphi %s713_s13, %s901_s13   ;;  %s673_s12 = sphi %s711_s12, %s900_s12  }
   0x4   : > { %s736_s18 = sadd.s32 1, %s685_s15   ;;  %s91_s19 = sadd.s32 1, %s681_s14 }
   0x5   : > { %s88_s20 = ssub.s32 %s685_s15, %s736_s18  ;;  %p101_p0 = scmp.ne.s32.totalorder %s681_s14, %s677_s13 }
   0x6   : > { %p89_p1 = scmp.eq.s32.totalorder %s88_s20, 0  ;;  %p102_p2 = scmp.eq.s32.totalorder %s732_s16, 1 }
   0x7   : > { %p107_p3 = scmp.ne.s32.totalorder %s677_s13, %s673_s12  ;;  %p108_p4 = scmp.eq.s32.totalorder %s493_s17, 1 }
   0x8   : > { %s747_s21 = scalar_select %p89_p1, %s681_s14, %s91_s19  }
   0x9   : > { %p749_p5 = por %p102_p2, %p101_p0  ;;  %p753_p6 = por %p108_p4, %p107_p3 }
   0xa   : > { %p496_p7 = scmp.ge.s32.totalorder %s685_s15, 1  ;;  %p142_p8 = scmp.lt.s32.totalorder %s685_s15, 3 }
   0xc   : > { %p143_p9 = pnand %p496_p7, %p142_p8 }
   0xd   : > { %v599_v0 = vld [vmem:[%s895_s1] sm:$0xff] (!%p143_p9)   ;;  %v687_v1 = vmov (!%p143_p9), 0   ;;  %s498_s26 = sshll.u32 (!%p143_p9), %s732_s16, 3  ;;  %v600_v2 = vld [vmem:[%s895_s1 + $0x8] sm:$0xff] (!%p143_p9)   ;;  %v601_v3 = vld [vmem:[%s895_s1 + $0x10] sm:$0xff] (!%p143_p9)   ;;  %vm323_vm0 = vcmask (!%p143_p9), 523264  }
   0xe   : > { %146 = sbr.rel (%p143_p9) target bundleno = 303 (0x12f), region = 32  ;;  %336 = vmatprep.subr.bf16.mxu0 (!%p143_p9), %v687_v1  ;;  %533 = vmatprep.subr.bf16.mxu1 (!%p143_p9), %v687_v1  ;;  %p168_p10 = scmp.lt.s32.totalorder (!%p143_p9), %s498_s26, 15  ;;  %v602_v4 = vld [vmem:[%s895_s1 + $0x18] sm:$0xff] (!%p143_p9)   ;;  %v603_v6 = vld [vmem:[%s895_s1 + $0x20] sm:$0xff] (!%p143_p9)   ;;  %v604_v8 = vld [vmem:[%s895_s1 + $0x28] sm:$0xff] (!%p143_p9)  }
   0xf   : > { %337 = vmatpush1.bf16.msra.mxu0 (!%p143_p9), %v599_v0  ;;  %545 = vmatpush1.bf16.msra.mxu1 (!%p143_p9), %v599_v0  ;;  %v605_v9 = vld [vmem:[%s895_s1 + $0x30] sm:$0xff] (!%p143_p9)   ;;  %v606_v10 = vld [vmem:[%s895_s1 + $0x38] sm:$0xff] (!%p143_p9)   ;;  %v607_v11 = vld [vmem:[%s895_s1 + $0x40] sm:$0xff] (!%p143_p9)   ;;  %s164_s8 = sand.u32 (!%p143_p9), 1, %s677_s13   ;;  %s532_s19 = sshll.u32 (!%p143_p9), %s732_s16, 10 }
  0x10   : > { %338 = vmatprep.subr.bf16.mxu0 (!%p143_p9), %v687_v1  ;;  %534 = vmatprep.subr.bf16.mxu1 (!%p143_p9), %v687_v1  ;;  %v608_v12 = vld [vmem:[%s895_s1 + $0x48] sm:$0xff] (!%p143_p9)   ;;  %v609_v13 = vld [vmem:[%s895_s1 + $0x50] sm:$0xff] (!%p143_p9)   ;;  %v610_v14 = vld [vmem:[%s895_s1 + $0x58] sm:$0xff] (!%p143_p9)   ;;  %s497_s17 = sshll.u32 (!%p143_p9), %s164_s8, 6  ;;  %s853_s16 = scalar_lea.sflag (!%p143_p9), [#allocation3], %s164_s8 }
  0x11   : > { %v501_v21 = vld [vmem:[%s896_s2] ss:$0 sm:$0xff] (!%p143_p9)  ;;  %s688_s28 = smov (!%p143_p9), [#allocation2]  }
  0x12   : > { %s627_s29 = sshll.u32 (!%p143_p9), %s688_s28, 4  ;;  %s628_s29 = int_to_ptr.vmem [resolvable:$false] %s627_s29 }
  0x13   : > { %339 = vmatpush1.bf16.msra.mxu0 (!%p143_p9), %v600_v2  ;;  %546 = vmatpush1.bf16.msra.mxu1 (!%p143_p9), %v600_v2  ;;  %s629_s30 = scalar_lea.vmem (!%p143_p9), %s628_s29, 2048 }
  0x14   : > { %340 = vmatprep.subr.bf16.mxu0 (!%p143_p9), %v687_v1  ;;  %535 = vmatprep.subr.bf16.mxu1 (!%p143_p9), %v687_v1 }
  0x15   : > { %s905_s26 = smov (!%p168_p10, %s498_s26), 15 }
  0x16   : > { %s531_s4 = sshll.u32 %s905_s26, 3  ;;  %s847_s26 = scalar_lea.hbm %s897_s3, %s532_s19 }
  0x17   : > { %341 = vmatpush1.bf16.msra.mxu0 %v601_v3  ;;  %547 = vmatpush1.bf16.msra.mxu1 %v601_v3  ;;  %s781_s9 = scalar_lea.vmem %s894_s0, %s531_s4 }
  0x18   : > { %342 = vmatprep.subr.bf16.mxu0 %v687_v1  ;;  %536 = vmatprep.subr.bf16.mxu1 %v687_v1  ;;  %v613_v5 = vld [vmem:[%s781_s9 + $0x4] ss:$8 sps:$4 sm:$0xff]   ;;  %v611_v15 = vld [vmem:[%s781_s9] ss:$8 sps:$4 sm:$0xff]   ;;  %v617_v17 = vld [vmem:[%s781_s9 + $0x14] ss:$8 sps:$4 sm:$0xff]  }
  0x19   : > { %v616_v7 = vld [vmem:[%s781_s9 + $0x24] ss:$8 sps:$4 sm:$0xff]   ;;  %522 = vmatprep.mubr.msk.bf16.mxu0 %vm323_vm0, %v613_v5  ;;  %v614_v16 = vld [vmem:[%s781_s9 + $0x20] ss:$8 sps:$4 sm:$0xff]   ;;  %v619_v18 = vld [vmem:[%s781_s9 + $0x34] ss:$8 sps:$4 sm:$0xff]  }
  0x1a   : > { %524 = vmatprep.mubr.msk.bf16.mxu1 %vm323_vm0, %v616_v7  ;;  %v621_v19 = vld [vmem:[%s781_s9 + $0x10] ss:$8 sps:$4 sm:$0xff]  }
  0x1b   : > { %343 = vmatpush1.bf16.msra.mxu0 %v602_v4  ;;  %548 = vmatpush1.bf16.msra.mxu1 %v602_v4  ;;  %v622_v20 = vld [vmem:[%s781_s9 + $0x30] ss:$8 sps:$4 sm:$0xff]   ;;  %s166_s9 = scalar_lea.vmem [#allocation2], %s497_s17 }
  0x1c   : > { %344 = vmatprep.subr.bf16.mxu0 %v687_v1  ;;  %537 = vmatprep.subr.bf16.mxu1 %v687_v1  ;;  %s431_s20 = sshll.u32 %s166_s9, 4  ;;  %s849_s20 = int_to_ptr.vmem [resolvable:$true] %s431_s20 }
  0x1d   : > { %s623_s27 = scalar_lea.vmem %s849_s20, 1024  ;;  %p630_p0 = scmp.lt.s32.totalorder %s849_s20, %s628_s29 }
  0x1e   : > { %p624_p11 = scmp.ne.s32.totalorder %s849_s20, %s623_s27  ;;  %p631_p1 = scmp.lt.s32.totalorder %s629_s30, %s623_s27 }
  0x1f   : > { %345 = vmatpush1.bf16.msra.mxu0 %v603_v6  ;;  %549 = vmatpush1.bf16.msra.mxu1 %v603_v6 }
  0x20   : > { %346 = vmatprep.subr.bf16.mxu0 %v687_v1  ;;  %538 = vmatprep.subr.bf16.mxu1 %v687_v1  ;;  %p625_p12 = pnand %p624_p11, %p749_p5  ;;  %p632_p2 = por %p631_p1, %p630_p0 }
  0x22   : > { %p626_p13 = pneg %p625_p12 }
  0x23   : > { %347 = vmatpush1.bf16.msra.mxu0 %v604_v8  ;;  %550 = vmatpush1.bf16.msra.mxu1 %v604_v8 }
  0x24   : > { %348 = vmatprep.subr.bf16.mxu0 %v687_v1  ;;  %539 = vmatprep.subr.bf16.mxu1 %v687_v1  ;;  %p633_p3 = pnand %p632_p2, %p626_p13 }
  0x27   : > { %349 = vmatpush1.bf16.msra.mxu0 %v605_v9  ;;  %551 = vmatpush1.bf16.msra.mxu1 %v605_v9 }
  0x28   : > { %350 = vmatprep.subr.bf16.mxu0 %v687_v1  ;;  %540 = vmatprep.subr.bf16.mxu1 %v687_v1 }
  0x2b   : > { %351 = vmatpush1.bf16.msra.mxu0 %v606_v10  ;;  %552 = vmatpush1.bf16.msra.mxu1 %v606_v10 }
  0x2c   : > { %352 = vmatprep.subr.bf16.mxu0 %v687_v1  ;;  %541 = vmatprep.subr.bf16.mxu1 %v687_v1 }
  0x2f   : > { %353 = vmatpush1.bf16.msra.mxu0 %v607_v11  ;;  %553 = vmatpush1.bf16.msra.mxu1 %v607_v11 }
  0x30   : > { %354 = vmatprep.subr.bf16.mxu0 %v687_v1  ;;  %542 = vmatprep.subr.bf16.mxu1 %v687_v1 }
  0x33   : > { %355 = vmatpush1.bf16.msra.mxu0 %v608_v12  ;;  %554 = vmatpush1.bf16.msra.mxu1 %v608_v12 }
  0x34   : > { %356 = vmatprep.subr.bf16.mxu0 %v687_v1  ;;  %543 = vmatprep.subr.bf16.mxu1 %v687_v1 }
  0x37   : > { %357 = vmatpush1.bf16.msra.mxu0 %v609_v13  ;;  %555 = vmatpush1.bf16.msra.mxu1 %v609_v13 }
  0x38   : > { %358 = vmatprep.subr.bf16.mxu0 %v687_v1  ;;  %544 = vmatprep.subr.bf16.mxu1 %v687_v1 }
  0x3b   : > { %359 = vmatpush1.bf16.msra.mxu0 %v610_v14  ;;  %556 = vmatpush1.bf16.msra.mxu1 %v610_v14 }
  0x3e   : > { %369 = vmatmul.mubr.bf16.vlgmr.msra.gmra.mrb[0].mxu0 %v611_v15  ;;  %385 = vmatmul.mubr.bf16.vlgmr.msra.gmra.mrb[0].mxu1 %v614_v16 }
  0x3f   : > { %523 = vmatprep.mubr.msk.bf16.mxu0 %vm323_vm0, %v617_v17  ;;  %525 = vmatprep.mubr.msk.bf16.mxu1 %vm323_vm0, %v619_v18 }
  0x46   : > { %377 = vmatmul.mubr.bf16.gmra.mrb[4].mxu0 %v621_v19  ;;  %393 = vmatmul.mubr.bf16.gmra.mrb[4].mxu1 %v622_v20 }
 0x111   : > { %v370_v22 = vpop.f32.mrb[0].mxu0  ;;  %v386_v23 = vpop.f32.mrb[0].mxu1 }
 0x112   : > { %v371_v24 = vadd.f32 %v501_v21, %v370_v22  ;;  %v387_v25 = vadd.f32 %v501_v21, %v386_v23  ;;  %v372_v26 = vpop.f32.mrb[1].mxu0  ;;  %v388_v27 = vpop.f32.mrb[1].mxu1 }
 0x113   : > { %v373_v28 = vpop.f32.mrb[2].mxu0  ;;  %v389_v29 = vpop.f32.mrb[2].mxu1 }
 0x114   : > { %v401_v30 = vmax.f32 %v371_v24, 0.0  ;;  %v405_v31 = vmax.f32 %v387_v25, 0.0  ;;  %v374_v32 = vadd.f32 %v501_v21, %v373_v28  ;;  %v390_v33 = vadd.f32 %v501_v21, %v389_v29  ;;  %v375_v34 = vpop.f32.mrb[3].mxu0  ;;  %v391_v35 = vpop.f32.mrb[3].mxu1 }
 0x116   : > { %409 = vst [vmem:[%s166_s9] sm:$0xff] %v401_v30  ;;  %413 = vst [vmem:[%s166_s9 + $0x20] sm:$0xff] %v405_v31  ;;  %v402_v36 = vmax.f32 %v374_v32, 0.0  ;;  %v406_v37 = vmax.f32 %v390_v33, 0.0 }
 0x118   : > { %410 = vst [vmem:[%s166_s9 + $0x8] sm:$0xff] %v402_v36  ;;  %414 = vst [vmem:[%s166_s9 + $0x28] sm:$0xff] %v406_v37 }
 0x119   : > { %v378_v38 = vpop.f32.mrb[4].mxu0  ;;  %v394_v39 = vpop.f32.mrb[4].mxu1 }
 0x11a   : > { %v379_v40 = vadd.f32 %v501_v21, %v378_v38  ;;  %v395_v41 = vadd.f32 %v501_v21, %v394_v39  ;;  %v380_v42 = vpop.f32.mrb[5].mxu0  ;;  %v396_v43 = vpop.f32.mrb[5].mxu1 }
 0x11b   : > { %v381_v44 = vpop.f32.mrb[6].mxu0  ;;  %v397_v45 = vpop.f32.mrb[6].mxu1 }
 0x11c   : > { %v403_v46 = vmax.f32 %v379_v40, 0.0  ;;  %v407_v47 = vmax.f32 %v395_v41, 0.0  ;;  %v382_v48 = vadd.f32 %v501_v21, %v381_v44  ;;  %v398_v49 = vadd.f32 %v501_v21, %v397_v45  ;;  %v383_v50 = vpop.f32.mrb[7].mxu0  ;;  %v399_v51 = vpop.f32.mrb[7].mxu1 }
 0x11e   : > { %411 = vst [vmem:[%s166_s9 + $0x10] sm:$0xff] %v403_v46  ;;  %415 = vst [vmem:[%s166_s9 + $0x30] sm:$0xff] %v407_v47  ;;  %v404_v52 = vmax.f32 %v382_v48, 0.0  ;;  %v408_v53 = vmax.f32 %v398_v49, 0.0 }
 0x120   : > { %412 = vst [vmem:[%s166_s9 + $0x18] sm:$0xff] %v404_v52  ;;  %416 = vst [vmem:[%s166_s9 + $0x38] sm:$0xff] %v408_v53 }
 0x121   : > { %636 = shalt.err (!%p633_p3)
}
 0x122   : > { %s637_s4 = scalar_lea.hbm %s847_s26, 1024  ;;  %s641_s7 = scalar_lea.hbm %s897_s3, 2048 }
 0x123   : > { %p638_p4 = scmp.ne.s32.totalorder %s847_s26, %s637_s4  ;;  %p642_p9 = scmp.lt.u32.totalorder %s847_s26, %s897_s3 }
 0x124   : > { %p643_p10 = scmp.lt.u32.totalorder %s641_s7, %s637_s4  ;;  %p645_p12 = scmp.lt.u32.totalorder %s637_s4, %s847_s26 }
 0x125   : > { %p639_p7 = pnand %p638_p4, %p749_p5 }
 0x126   : > { %p644_p11 = por %p643_p10, %p642_p9 }
 0x127   : > { %p640_p8 = pneg %p639_p7 }
 0x128   : > { %p646_p13 = por %p645_p12, %p644_p11 }
 0x12a   : > { %p647_p0 = pnand %p646_p13, %p640_p8 }
 0x12c   : > { %650 = shalt.err (!%p647_p0)
}
 0x12d   : > { %s689_s11 = smov 128   ;;  %s690_s17 = smov 8  }
 0x12e   : > { %557 = dma.vmem_to_hbm [thread:$0]  (%p749_p5), %s849_s20, 1024, %s847_s26, %s853_s16, %s689_s11, %s689_s11, %s690_s17  }
 0x12f PF: > { %p563_p1 = scmp.ge.s32.totalorder %s685_s15, 2  ;;  %s446_s9 = sand.u32 1, %s673_s12  }
 0x130   : > { %s447_s19 = scalar_lea.sflag [#allocation3], %s446_s9 }
 0x131   : > { %p560_p2 = pnand %p563_p1, %p753_p6 }
 0x133   : > { %668 = dma.done.wait (!%p560_p2), %s447_s19, 1024  }
 0x134   : > { %670 = vsyncadd (!%p560_p2), %s447_s19, 4294966272  ;;  %p13_p3 = scmp.ge.s32.totalorder %s736_s18, 4   ;;  %s900_s12 = smov %s677_s13 }
 0x135   : > { %s901_s13 = smov %s681_s14  ;;  %s902_s14 = smov %s747_s21 }
 0x136   : > { %s903_s15 = smov %s736_s18  ;;  %15 = sbr.rel (!%p13_p3) target bundleno = 3 (0x3), region = 67 }
 0x13d   :  { %452 = vsyncpa [#allocation3], 1 }
 0x13e   :  { %454 = vsyncpa [#allocation3 + $0x1], 1 }

</bundles_post_ra>
